<compile_context>
chip_gen: v6e
topology: v6e:2x2x1
jax: 0.10.0
libtpu: 0.0.40
codegen_flags: <defaults>
</compile_context>

<pallas_src>
import functools

import jax
import jax.numpy as jnp
from jax.experimental import pallas as pl
from jax.experimental.pallas import tpu as pltpu


def _round_up(x, m):
    return (x + m - 1) // m * m


# ---------------------------------------------------------------------------
# Kernel
# ---------------------------------------------------------------------------
def _mlp_kernel(x_ref, w_ref, b_ref, out_ref, *, layer_dims):
    """Fused (Linear -> ReLU) x 5 -> Linear on one batch tile.

    x_ref   : (block_m, in_pad)            f32
    w_ref   : (sum(in_pad_i), max_out_pad) bf16  -- all 6 weights, row-banded
    b_ref   : (1, sum(out_pad_i))          f32   -- all 6 biases, concatenated
    out_ref : (block_m, out_pad_last)      f32   -- lane-dense (padded to 128)
    layer_dims: static tuple of (in_pad_i, out_pad_i)
    """
    h = x_ref[...]  # f32 activations
    n = len(layer_dims)
    row = 0
    col = 0
    for i, (in_p, out_p) in enumerate(layer_dims):
        w = w_ref[row:row + in_p, :out_p]        # bf16, static tile-aligned slice
        b = b_ref[:, col:col + out_p]            # f32
        h = jnp.dot(h.astype(jnp.bfloat16), w,
                    preferred_element_type=jnp.float32) + b
        if i < n - 1:                            # ReLU on all but the last layer
            h = jnp.maximum(h, 0.0)
        row += in_p
        col += out_p
    out_ref[...] = h.astype(out_ref.dtype)


# ---------------------------------------------------------------------------
# Parameter packing (host side, one-time)
# ---------------------------------------------------------------------------
def pack_params(params):
    """params: list of (W (in,out) f32, b (out,) f32).

    Returns:
      w_packed : (sum(in_pad_i), max_out_pad) bf16, zero-padded row bands
      b_packed : (1, sum(out_pad_i)) f32, zero-padded
      layer_dims: tuple of (in_pad_i, out_pad_i)
    """
    layer_dims = []
    for w, _ in params:
        fi, fo = w.shape
        layer_dims.append((_round_up(fi, 128), _round_up(fo, 128)))
    max_out = max(o for _, o in layer_dims)

    w_bands, b_parts = [], []
    for (w, b), (in_p, out_p) in zip(params, layer_dims):
        fi, fo = w.shape
        wp = jnp.zeros((in_p, max_out), jnp.float32).at[:fi, :fo].set(w)
        w_bands.append(wp)
        bp = jnp.zeros((1, out_p), jnp.float32).at[0, :fo].set(b.reshape(-1))
        b_parts.append(bp)

    w_packed = jnp.concatenate(w_bands, axis=0).astype(jnp.bfloat16)
    b_packed = jnp.concatenate(b_parts, axis=1)
    return w_packed, b_packed, tuple(layer_dims)


# ---------------------------------------------------------------------------
# Wrapper
# ---------------------------------------------------------------------------
def original_net_forward(x, params, *, block_m=256):
    """x: (N, C, H, W) f32; params: list of (W (in,out) f32, b (out,) f32)."""
    batch = x.shape[0]
    x_flat = x.reshape(batch, -1).astype(jnp.float32)

    w_packed, b_packed, layer_dims = pack_params(params)
    in_pad = layer_dims[0][0]
    out_pad = layer_dims[-1][1]
    out_dim = params[-1][0].shape[1]

    # Pad features / batch so every block is (8,128)-friendly.
    feat = x_flat.shape[1]
    if feat < in_pad:
        x_flat = jnp.pad(x_flat, ((0, 0), (0, in_pad - feat)))
    bm = min(block_m, _round_up(batch, 8))
    batch_pad = _round_up(batch, bm)
    if batch_pad > batch:
        x_flat = jnp.pad(x_flat, ((0, batch_pad - batch), (0, 0)))

    grid = (batch_pad // bm,)

    flops = 2 * batch_pad * sum(i * o for i, o in layer_dims)
    bytes_accessed = (w_packed.size * 2 + b_packed.size * 4
                      + x_flat.size * 4 + batch_pad * out_pad * 4)

    kernel = functools.partial(_mlp_kernel, layer_dims=layer_dims)

    out = pl.pallas_call(
        kernel,
        out_shape=jax.ShapeDtypeStruct((batch_pad, out_pad), jnp.float32),
        grid_spec=pltpu.PrefetchScalarGridSpec(
            num_scalar_prefetch=0,
            grid=grid,
            in_specs=[
                pl.BlockSpec((bm, in_pad), lambda m: (m, 0)),          # x tile
                pl.BlockSpec(w_packed.shape, lambda m: (0, 0)),        # weights resident
                pl.BlockSpec(b_packed.shape, lambda m: (0, 0)),        # biases resident
            ],
            out_specs=pl.BlockSpec((bm, out_pad), lambda m: (m, 0)),   # lane-dense
        ),
        compiler_params=pltpu.CompilerParams(
            dimension_semantics=("parallel",),
            vmem_limit_bytes=32 * 1024 * 1024,
        ),
        cost_estimate=pl.CostEstimate(
            flops=flops, transcendentals=0, bytes_accessed=bytes_accessed),
    )(x_flat, w_packed, b_packed)

    return out[:batch, :out_dim]


# ---------------------------------------------------------------------------
# Init + references
# ---------------------------------------------------------------------------
def init_params(key, input_size, hidden_sizes, output_size):
    """Deterministic init mimicking nn.Linear's U(-1/sqrt(fan_in), 1/sqrt(fan_in))."""
    dims = [input_size] + list(hidden_sizes) + [output_size]
    params = []
    for i in range(len(dims) - 1):
        fan_in, fan_out = dims[i], dims[i + 1]
        key, kw, kb = jax.random.split(key, 3)
        bound = 1.0 / jnp.sqrt(fan_in)
        w = jax.random.uniform(kw, (fan_in, fan_out), jnp.float32, -bound, bound)
        b = jax.random.uniform(kb, (fan_out,), jnp.float32, -bound, bound)
        params.append((w, b))
    return params


def reference_forward_f32(x, params):
    """Pure-f32 JAX reference matching the PyTorch forward exactly."""
    h = x.reshape(x.shape[0], -1)
    n = len(params)
    for i, (w, b) in enumerate(params):
        h = h @ w + b.reshape(1, -1)
        if i < n - 1:
            h = jnp.maximum(h, 0.0)
    return h


def reference_forward_bf16(x, params):
    """Reference mirroring the kernel's numerics (bf16 matmul inputs, f32 acc)."""
    h = x.reshape(x.shape[0], -1).astype(jnp.float32)
    n = len(params)
    for i, (w, b) in enumerate(params):
        h = jnp.dot(h.astype(jnp.bfloat16), w.astype(jnp.bfloat16),
                    preferred_element_type=jnp.float32) + b.reshape(1, -1)
        if i < n - 1:
            h = jnp.maximum(h, 0.0)
    return h


if __name__ == "__main__":
    # Small shapes consistent with the module: flatten (2, 4, 16, 16) -> 1024 features.
    batch, C, H, W = 2, 4, 16, 16
    input_size = C * H * W           # 1024
    hidden_sizes = [256, 128, 128, 128, 64]
    output_size = 10

    key = jax.random.PRNGKey(0)
    key, kx = jax.random.split(key)
    x = jax.random.normal(kx, (batch, C, H, W), jnp.float32)
    params = init_params(key, input_size, hidden_sizes, output_size)

    out = original_net_forward(x, params)
    out = jax.block_until_ready(out)
    assert out.shape == (batch, output_size)

    ref_bf16 = reference_forward_bf16(x, params)
    ref_f32 = reference_forward_f32(x, params)
    assert jnp.allclose(out, ref_bf16, atol=5e-3, rtol=5e-3), \
        "mismatch vs bf16-matched JAX reference"
    assert jnp.allclose(out, ref_f32, atol=5e-2, rtol=5e-2), \
        "mismatch vs f32 JAX reference"

    print("KERNEL_OK")
</pallas_src>

<mosaic_0001>
module attributes {stable_mosaic.version = 11 : i64} {
  func.func @_mlp_kernel(%arg0: i32, %arg1: memref<8x1024xf32, #tpu.memory_space<vmem>>, %arg2: memref<1792x256xbf16, #tpu.memory_space<vmem>>, %arg3: memref<1x896xf32, #tpu.memory_space<vmem>>, %arg4: memref<8x128xf32, #tpu.memory_space<vmem>>) attributes {dimension_semantics = [#tpu.dimension_semantics<parallel>], iteration_bounds = array<i64: 1>, scalar_prefetch = 0 : i64, scratch_operands = 0 : i64, tpu.core_type = #tpu.core_type<tc>, window_params = [{transform_indices = @transform_0, window_bounds = array<i64: 8, 1024>}, {pipeline_mode = #tpu.pipeline_mode<synchronous>, transform_indices = @transform_1, window_bounds = array<i64: 1792, 256>}, {pipeline_mode = #tpu.pipeline_mode<synchronous>, transform_indices = @transform_2, window_bounds = array<i64: 1, 896>}, {transform_indices = @transform_3, window_bounds = array<i64: 8, 128>}]} {
    %c0 = arith.constant 0 : index
    %c0_0 = arith.constant 0 : index
    %0 = vector.load %arg1[%c0, %c0_0] : memref<8x1024xf32, #tpu.memory_space<vmem>>, vector<8x1024xf32>
    %c0_1 = arith.constant 0 : index
    %c0_2 = arith.constant 0 : index
    %1 = vector.load %arg2[%c0_1, %c0_2] : memref<1792x256xbf16, #tpu.memory_space<vmem>>, vector<1024x256xbf16>
    %c0_3 = arith.constant 0 : index
    %c0_4 = arith.constant 0 : index
    %2 = vector.load %arg3[%c0_3, %c0_4] : memref<1x896xf32, #tpu.memory_space<vmem>>, vector<1x256xf32>
    %3 = arith.truncf %0 : vector<8x1024xf32> to vector<8x1024xbf16>
    %cst = arith.constant dense<0.000000e+00> : vector<8x256xf32>
    %4 = tpu.matmul %3, %1, %cst {dimension_numbers = #tpu.dot_dimension_numbers<[1], [0], [0], [1], [0, 0, 1, 1], [], []>} : vector<8x1024xbf16>, vector<1024x256xbf16>, vector<8x256xf32> -> vector<8x256xf32>
    %5 = vector.broadcast %2 : vector<1x256xf32> to vector<8x256xf32>
    %6 = arith.addf %4, %5 : vector<8x256xf32>
    %cst_5 = arith.constant 0.000000e+00 : f32
    %7 = vector.broadcast %cst_5 : f32 to vector<8x256xf32>
    %8 = arith.maximumf %6, %7 : vector<8x256xf32>
    %c1024 = arith.constant 1024 : index
    %c0_6 = arith.constant 0 : index
    %9 = vector.load %arg2[%c1024, %c0_6] : memref<1792x256xbf16, #tpu.memory_space<vmem>>, vector<256x128xbf16>
    %c0_7 = arith.constant 0 : index
    %c256 = arith.constant 256 : index
    %10 = vector.load %arg3[%c0_7, %c256] : memref<1x896xf32, #tpu.memory_space<vmem>>, vector<1x128xf32>
    %11 = arith.truncf %8 : vector<8x256xf32> to vector<8x256xbf16>
    %cst_8 = arith.constant dense<0.000000e+00> : vector<8x128xf32>
    %12 = tpu.matmul %11, %9, %cst_8 {dimension_numbers = #tpu.dot_dimension_numbers<[1], [0], [0], [1], [0, 0, 1, 1], [], []>} : vector<8x256xbf16>, vector<256x128xbf16>, vector<8x128xf32> -> vector<8x128xf32>
    %13 = vector.broadcast %10 : vector<1x128xf32> to vector<8x128xf32>
    %14 = arith.addf %12, %13 : vector<8x128xf32>
    %cst_9 = arith.constant 0.000000e+00 : f32
    %15 = vector.broadcast %cst_9 : f32 to vector<8x128xf32>
    %16 = arith.maximumf %14, %15 : vector<8x128xf32>
    %c1280 = arith.constant 1280 : index
    %c0_10 = arith.constant 0 : index
    %17 = vector.load %arg2[%c1280, %c0_10] : memref<1792x256xbf16, #tpu.memory_space<vmem>>, vector<128x128xbf16>
    %c0_11 = arith.constant 0 : index
    %c384 = arith.constant 384 : index
    %18 = vector.load %arg3[%c0_11, %c384] : memref<1x896xf32, #tpu.memory_space<vmem>>, vector<1x128xf32>
    %19 = arith.truncf %16 : vector<8x128xf32> to vector<8x128xbf16>
    %cst_12 = arith.constant dense<0.000000e+00> : vector<8x128xf32>
    %20 = tpu.matmul %19, %17, %cst_12 {dimension_numbers = #tpu.dot_dimension_numbers<[1], [0], [0], [1], [0, 0, 1, 1], [], []>} : vector<8x128xbf16>, vector<128x128xbf16>, vector<8x128xf32> -> vector<8x128xf32>
    %21 = vector.broadcast %18 : vector<1x128xf32> to vector<8x128xf32>
    %22 = arith.addf %20, %21 : vector<8x128xf32>
    %cst_13 = arith.constant 0.000000e+00 : f32
    %23 = vector.broadcast %cst_13 : f32 to vector<8x128xf32>
    %24 = arith.maximumf %22, %23 : vector<8x128xf32>
    %c1408 = arith.constant 1408 : index
    %c0_14 = arith.constant 0 : index
    %25 = vector.load %arg2[%c1408, %c0_14] : memref<1792x256xbf16, #tpu.memory_space<vmem>>, vector<128x128xbf16>
    %c0_15 = arith.constant 0 : index
    %c512 = arith.constant 512 : index
    %26 = vector.load %arg3[%c0_15, %c512] : memref<1x896xf32, #tpu.memory_space<vmem>>, vector<1x128xf32>
    %27 = arith.truncf %24 : vector<8x128xf32> to vector<8x128xbf16>
    %cst_16 = arith.constant dense<0.000000e+00> : vector<8x128xf32>
    %28 = tpu.matmul %27, %25, %cst_16 {dimension_numbers = #tpu.dot_dimension_numbers<[1], [0], [0], [1], [0, 0, 1, 1], [], []>} : vector<8x128xbf16>, vector<128x128xbf16>, vector<8x128xf32> -> vector<8x128xf32>
    %29 = vector.broadcast %26 : vector<1x128xf32> to vector<8x128xf32>
    %30 = arith.addf %28, %29 : vector<8x128xf32>
    %cst_17 = arith.constant 0.000000e+00 : f32
    %31 = vector.broadcast %cst_17 : f32 to vector<8x128xf32>
    %32 = arith.maximumf %30, %31 : vector<8x128xf32>
    %c1536 = arith.constant 1536 : index
    %c0_18 = arith.constant 0 : index
    %33 = vector.load %arg2[%c1536, %c0_18] : memref<1792x256xbf16, #tpu.memory_space<vmem>>, vector<128x128xbf16>
    %c0_19 = arith.constant 0 : index
    %c640 = arith.constant 640 : index
    %34 = vector.load %arg3[%c0_19, %c640] : memref<1x896xf32, #tpu.memory_space<vmem>>, vector<1x128xf32>
    %35 = arith.truncf %32 : vector<8x128xf32> to vector<8x128xbf16>
    %cst_20 = arith.constant dense<0.000000e+00> : vector<8x128xf32>
    %36 = tpu.matmul %35, %33, %cst_20 {dimension_numbers = #tpu.dot_dimension_numbers<[1], [0], [0], [1], [0, 0, 1, 1], [], []>} : vector<8x128xbf16>, vector<128x128xbf16>, vector<8x128xf32> -> vector<8x128xf32>
    %37 = vector.broadcast %34 : vector<1x128xf32> to vector<8x128xf32>
    %38 = arith.addf %36, %37 : vector<8x128xf32>
    %cst_21 = arith.constant 0.000000e+00 : f32
    %39 = vector.broadcast %cst_21 : f32 to vector<8x128xf32>
    %40 = arith.maximumf %38, %39 : vector<8x128xf32>
    %c1664 = arith.constant 1664 : index
    %c0_22 = arith.constant 0 : index
    %41 = vector.load %arg2[%c1664, %c0_22] : memref<1792x256xbf16, #tpu.memory_space<vmem>>, vector<128x128xbf16>
    %c0_23 = arith.constant 0 : index
    %c768 = arith.constant 768 : index
    %42 = vector.load %arg3[%c0_23, %c768] : memref<1x896xf32, #tpu.memory_space<vmem>>, vector<1x128xf32>
    %43 = arith.truncf %40 : vector<8x128xf32> to vector<8x128xbf16>
    %cst_24 = arith.constant dense<0.000000e+00> : vector<8x128xf32>
    %44 = tpu.matmul %43, %41, %cst_24 {dimension_numbers = #tpu.dot_dimension_numbers<[1], [0], [0], [1], [0, 0, 1, 1], [], []>} : vector<8x128xbf16>, vector<128x128xbf16>, vector<8x128xf32> -> vector<8x128xf32>
    %45 = vector.broadcast %42 : vector<1x128xf32> to vector<8x128xf32>
    %46 = arith.addf %44, %45 : vector<8x128xf32>
    %c0_25 = arith.constant 0 : index
    %c0_26 = arith.constant 0 : index
    %47 = vector.load %arg4[%c0_25, %c0_26] : memref<8x128xf32, #tpu.memory_space<vmem>>, vector<8x128xf32>
    tpu.vector_store %arg4[%c0_25, %c0_26], %46 {strides = array<i32>} : memref<8x128xf32, #tpu.memory_space<vmem>>, vector<8x128xf32>,
    return
  }
  func.func @transform_0(%arg0: i32) -> (i32, i32) {
    %c0_i32 = arith.constant 0 : i32
    %c0_i32_0 = arith.constant 0 : i32
    return %arg0, %c0_i32 : i32, i32
  }
  func.func @transform_1(%arg0: i32) -> (i32, i32) {
    %c0_i32 = arith.constant 0 : i32
    %c0_i32_0 = arith.constant 0 : i32
    %c0_i32_1 = arith.constant 0 : i32
    return %c0_i32, %c0_i32_0 : i32, i32
  }
  func.func @transform_2(%arg0: i32) -> (i32, i32) {
    %c0_i32 = arith.constant 0 : i32
    %c0_i32_0 = arith.constant 0 : i32
    %c0_i32_1 = arith.constant 0 : i32
    return %c0_i32, %c0_i32_0 : i32, i32
  }
  func.func @transform_3(%arg0: i32) -> (i32, i32) {
    %c0_i32 = arith.constant 0 : i32
    %c0_i32_0 = arith.constant 0 : i32
    return %arg0, %c0_i32 : i32, i32
  }
}

</mosaic_0001>

<bundles_post_ra>
// kernel: tpu_custom_call.1
= control target key start
LH: loop header
LB: loop body
LE: loop exit
PB: predicated region body
PF: predicated region fallthrough
CT: control target
= control target key end

     0   :  { %8 = vsyncpa [#allocation3], 0  ;;  %s2394_s0 = inlined_call_operand.hbm [shape: f32[8,1024], index: 0, kind: input, shape index: {}]   ;;  %s2395_s1 = inlined_call_operand.hbm [shape: bf16[1792,256], index: 1, kind: input, shape index: {}]   ;;  %s2396_s2 = inlined_call_operand.hbm [shape: f32[1,896], index: 2, kind: input, shape index: {}]   ;;  %s2397_s3 = inlined_call_operand.hbm [shape: f32[8,128], index: 3, kind: output, shape index: {}]  }
   0x1   :  { %9 = vsyncpa [#allocation6], 0 }
   0x2   :  { %10 = vsyncpa [#allocation4], 0  ;;  %s2314_s12 = smov [#allocation5]  }
   0x3   :  { %s26_s13 = sshll.u32 %s2314_s12, 4  ;;  %s27_s13 = int_to_ptr.vmem [resolvable:$true] %s26_s13 }
   0x4   :  { %s2236_s14 = scalar_lea.vmem %s27_s13, 28672  ;;  %p2241_p1 = scmp.lt.s32.totalorder %s27_s13, %s27_s13 }
   0x5   :  { %p2237_p0 = scmp.ne.s32.totalorder %s27_s13, %s2236_s14  ;;  %p2242_p2 = scmp.lt.s32.totalorder %s2236_s14, %s2236_s14 }
   0x7   :  { %p2243_p3 = por %p2242_p2, %p2241_p1 }
   0x9   :  { %p2244_p4 = pnand %p2243_p3, %p2237_p0 }
   0xb   :  { %2247 = shalt.err (!%p2244_p4)
}
   0xc   :  { %s2315_s15 = smov 128   ;;  %s2316_s16 = smov 8  }
   0xd   :  { %32 = dma.hbm_to_vmem [thread:$0]  %s2395_s1, 28672, %s27_s13, [#allocation6], %s2315_s15, %s2315_s15, %s2316_s16  }
   0xe   :  { %s2317_s19 = smov [#allocation2]   ;;  %s2318_s21 = smov [#allocation7]  }
   0xf   :  { %s17_s20 = sshll.u32 %s2317_s19, 4  ;;  %s39_s22 = sshll.u32 %s2318_s21, 4  ;;  %s18_s20 = int_to_ptr.vmem [resolvable:$true] %s17_s20  ;;  %s40_s22 = int_to_ptr.vmem [resolvable:$true] %s39_s22 }
  0x10   :  { %s2256_s23 = scalar_lea.vmem %s18_s20, 1024  ;;  %p2261_p6 = scmp.lt.s32.totalorder %s18_s20, %s18_s20 }
  0x11   :  { %p2257_p5 = scmp.ne.s32.totalorder %s18_s20, %s2256_s23  ;;  %p2262_p7 = scmp.lt.s32.totalorder %s2256_s23, %s2256_s23 }
  0x13   :  { %p2263_p8 = por %p2262_p7, %p2261_p6 }
  0x15   :  { %p2264_p9 = pnand %p2263_p8, %p2257_p5 }
  0x17   :  { %2267 = shalt.err (!%p2264_p9)
}
  0x18   :  { %20 = dma.hbm_to_vmem [thread:$0]  %s2394_s0, 1024, %s18_s20, [#allocation3]  }
  0x19   :  { %s2276_s26 = scalar_lea.vmem %s40_s22, 112  ;;  %s2280_s1 = scalar_lea.vmem %s40_s22, 128 }
  0x1a   :  { %p2277_p10 = scmp.ne.s32.totalorder %s40_s22, %s2276_s26  ;;  %p2281_p11 = scmp.lt.s32.totalorder %s40_s22, %s40_s22 }
  0x1b   :  { %p2282_p12 = scmp.lt.s32.totalorder %s2280_s1, %s2276_s26 }
  0x1d   :  { %p2283_p13 = por %p2282_p12, %p2281_p11 }
  0x1f   :  { %p2284_p0 = pnand %p2283_p13, %p2277_p10 }
  0x21   :  { %2287 = shalt.err (!%p2284_p0)
}
  0x22   :  { %42 = dma.hbm_to_vmem [thread:$0]  %s2396_s2, 112, %s40_s22, [#allocation6]  }
  0x23   :  { %2308 = dma.done.wait [#allocation3], 1024  }
  0x24   :  { %2309 = vsyncadd [#allocation3], 4294966272 }
  0x25   :  { %2310 = dma.done.wait [#allocation6], 28784  }
  0x26   :  { %2311 = vsyncadd [#allocation6], 4294938512  ;;  %v1988_v0 = vld [vmem:[#allocation5 + $0x74] ss:$8 sps:$4 sm:$0xff]   ;;  %v1992_v2 = vld [vmem:[#allocation5 + $0x70] ss:$8 sps:$4 sm:$0xff]  }
  0x27   :  { %v1990_v1 = vld [vmem:[#allocation5 + $0x174] ss:$8 sps:$4 sm:$0xff]   ;;  %849 = vmatprep.subr.bf16.mxu0 %v1988_v0  ;;  %v1993_v3 = vld [vmem:[#allocation5 + $0x170] ss:$8 sps:$4 sm:$0xff]   ;;  %v1994_v4 = vld [vmem:[#allocation5 + $0x64] ss:$8 sps:$4 sm:$0xff]  }
  0x28   :  { %890 = vmatprep.subr.bf16.mxu1 %v1990_v1  ;;  %850 = vmatpush1.bf16.msra.mxu0 %v1992_v2  ;;  %v1996_v5 = vld [vmem:[#allocation5 + $0x164] ss:$8 sps:$4 sm:$0xff]   ;;  %v1998_v6 = vld [vmem:[#allocation5 + $0x60] ss:$8 sps:$4 sm:$0xff]   ;;  %v2000_v8 = vld [vmem:[#allocation5 + $0x54] ss:$8 sps:$4 sm:$0xff]  }
  0x29   :  { %891 = vmatpush1.bf16.msra.mxu1 %v1993_v3  ;;  %851 = vmatprep.subr.bf16.mxu0 %v1994_v4  ;;  %v1999_v7 = vld [vmem:[#allocation5 + $0x160] ss:$8 sps:$4 sm:$0xff]   ;;  %v2002_v9 = vld [vmem:[#allocation5 + $0x154] ss:$8 sps:$4 sm:$0xff]   ;;  %v2004_v10 = vld [vmem:[#allocation5 + $0x50] ss:$8 sps:$4 sm:$0xff]  }
  0x2a   :  { %892 = vmatprep.subr.bf16.mxu1 %v1996_v5  ;;  %v2005_v11 = vld [vmem:[#allocation5 + $0x150] ss:$8 sps:$4 sm:$0xff]   ;;  %v2006_v12 = vld [vmem:[#allocation5 + $0x44] ss:$8 sps:$4 sm:$0xff]   ;;  %v2010_v14 = vld [vmem:[#allocation5 + $0x40] ss:$8 sps:$4 sm:$0xff]  }
  0x2b   :  { %v2008_v13 = vld [vmem:[#allocation5 + $0x144] ss:$8 sps:$4 sm:$0xff]   ;;  %v2011_v15 = vld [vmem:[#allocation5 + $0x140] ss:$8 sps:$4 sm:$0xff]   ;;  %v2012_v16 = vld [vmem:[#allocation5 + $0x34] ss:$8 sps:$4 sm:$0xff]  }
  0x2c   :  { %852 = vmatpush1.bf16.msra.mxu0 %v1998_v6  ;;  %v2014_v17 = vld [vmem:[#allocation5 + $0x134] ss:$8 sps:$4 sm:$0xff]   ;;  %v2016_v18 = vld [vmem:[#allocation5 + $0x30] ss:$8 sps:$4 sm:$0xff]   ;;  %v2018_v20 = vld [vmem:[#allocation5 + $0x24] ss:$8 sps:$4 sm:$0xff]  }
  0x2d   :  { %893 = vmatpush1.bf16.msra.mxu1 %v1999_v7  ;;  %853 = vmatprep.subr.bf16.mxu0 %v2000_v8  ;;  %v2017_v19 = vld [vmem:[#allocation5 + $0x130] ss:$8 sps:$4 sm:$0xff]   ;;  %v2020_v21 = vld [vmem:[#allocation5 + $0x124] ss:$8 sps:$4 sm:$0xff]   ;;  %v2022_v22 = vld [vmem:[#allocation5 + $0x20] ss:$8 sps:$4 sm:$0xff]  }
  0x2e   :  { %894 = vmatprep.subr.bf16.mxu1 %v2002_v9  ;;  %v2023_v23 = vld [vmem:[#allocation5 + $0x120] ss:$8 sps:$4 sm:$0xff]   ;;  %v2024_v24 = vld [vmem:[#allocation5 + $0x14] ss:$8 sps:$4 sm:$0xff]   ;;  %v2028_v26 = vld [vmem:[#allocation5 + $0x10] ss:$8 sps:$4 sm:$0xff]  }
  0x2f   :  { %v2026_v25 = vld [vmem:[#allocation5 + $0x114] ss:$8 sps:$4 sm:$0xff]   ;;  %v2029_v27 = vld [vmem:[#allocation5 + $0x110] ss:$8 sps:$4 sm:$0xff]   ;;  %v2030_v28 = vld [vmem:[#allocation5 + $0x4] ss:$8 sps:$4 sm:$0xff]  }
  0x30   :  { %854 = vmatpush1.bf16.msra.mxu0 %v2004_v10  ;;  %v2032_v29 = vld [vmem:[#allocation5 + $0x104] ss:$8 sps:$4 sm:$0xff]   ;;  %v2034_v30 = vld [vmem:[#allocation5] ss:$8 sps:$4 sm:$0xff]   ;;  %v2036_v32 = vld [vmem:[#allocation5 + $0xf4] ss:$8 sps:$4 sm:$0xff]  }
  0x31   :  { %895 = vmatpush1.bf16.msra.mxu1 %v2005_v11  ;;  %855 = vmatprep.subr.bf16.mxu0 %v2006_v12  ;;  %v2035_v31 = vld [vmem:[#allocation5 + $0x100] ss:$8 sps:$4 sm:$0xff]   ;;  %v2038_v33 = vld [vmem:[#allocation5 + $0x1f4] ss:$8 sps:$4 sm:$0xff]   ;;  %v2040_v34 = vld [vmem:[#allocation5 + $0xf0] ss:$8 sps:$4 sm:$0xff]  }
  0x32   :  { %896 = vmatprep.subr.bf16.mxu1 %v2008_v13  ;;  %v2041_v35 = vld [vmem:[#allocation5 + $0x1f0] ss:$8 sps:$4 sm:$0xff]   ;;  %v2042_v36 = vld [vmem:[#allocation5 + $0xe4] ss:$8 sps:$4 sm:$0xff]   ;;  %v2046_v38 = vld [vmem:[#allocation5 + $0xe0] ss:$8 sps:$4 sm:$0xff]  }
  0x33   :  { %v2044_v37 = vld [vmem:[#allocation5 + $0x1e4] ss:$8 sps:$4 sm:$0xff]   ;;  %v2047_v39 = vld [vmem:[#allocation5 + $0x1e0] ss:$8 sps:$4 sm:$0xff]   ;;  %v2048_v40 = vld [vmem:[#allocation5 + $0xd4] ss:$8 sps:$4 sm:$0xff]  }
  0x34   :  { %856 = vmatpush1.bf16.msra.mxu0 %v2010_v14  ;;  %v2050_v41 = vld [vmem:[#allocation5 + $0x1d4] ss:$8 sps:$4 sm:$0xff]   ;;  %v2052_v42 = vld [vmem:[#allocation5 + $0xd0] ss:$8 sps:$4 sm:$0xff]   ;;  %v2054_v44 = vld [vmem:[#allocation5 + $0xc4] ss:$8 sps:$4 sm:$0xff]  }
  0x35   :  { %897 = vmatpush1.bf16.msra.mxu1 %v2011_v15  ;;  %857 = vmatprep.subr.bf16.mxu0 %v2012_v16  ;;  %v2053_v43 = vld [vmem:[#allocation5 + $0x1d0] ss:$8 sps:$4 sm:$0xff]   ;;  %v2056_v45 = vld [vmem:[#allocation5 + $0x1c4] ss:$8 sps:$4 sm:$0xff]   ;;  %v2058_v47 = vld [vmem:[#allocation5 + $0xc0] ss:$8 sps:$4 sm:$0xff]  }
  0x36   :  { %898 = vmatprep.subr.bf16.mxu1 %v2014_v17  ;;  %v54_v46 = vld [vmem:[#allocation2 + $0x8] sm:$0xff]  ;;  %v56_v50 = vld [vmem:[#allocation2 + $0x18] sm:$0xff]  ;;  %v53_v4 = vld [vmem:[#allocation2] sm:$0xff]  ;;  %vm2320_vm0 = vmmov 0   ;;  %s2321_s0 = smov [#allocation8]  }
  0x37   :  { %v2059_v48 = vld [vmem:[#allocation5 + $0x1c0] ss:$8 sps:$4 sm:$0xff]   ;;  %v191_v49 = vpack.c.bf16 %v54_v46, %v54_v46  ;;  %v2060_v51 = vld [vmem:[#allocation5 + $0xb4] ss:$8 sps:$4 sm:$0xff]   ;;  %v193_v52 = vpack.c.bf16 %v56_v50, %v56_v50  ;;  %v2064_v54 = vld [vmem:[#allocation5 + $0xb0] ss:$8 sps:$4 sm:$0xff]   ;;  %v190_v8 = vpack.c.bf16 %v53_v4, %v53_v4 }
  0x38   :  { %858 = vmatpush1.bf16.msra.mxu0 %v2016_v18  ;;  %v2062_v53 = vld [vmem:[#allocation5 + $0x1b4] ss:$8 sps:$4 sm:$0xff]   ;;  %v2065_v55 = vld [vmem:[#allocation5 + $0x1b0] ss:$8 sps:$4 sm:$0xff]   ;;  %v2066_v56 = vld [vmem:[#allocation5 + $0xa4] ss:$8 sps:$4 sm:$0xff]  }
  0x39   :  { %899 = vmatpush1.bf16.msra.mxu1 %v2017_v19  ;;  %859 = vmatprep.subr.bf16.mxu0 %v2018_v20  ;;  %v2068_v57 = vld [vmem:[#allocation5 + $0x1a4] ss:$8 sps:$4 sm:$0xff]   ;;  %v2070_v58 = vld [vmem:[#allocation5 + $0xa0] ss:$8 sps:$4 sm:$0xff]   ;;  %v2072_v60 = vld [vmem:[#allocation5 + $0x94] ss:$8 sps:$4 sm:$0xff]  }
  0x3a   :  { %900 = vmatprep.subr.bf16.mxu1 %v2020_v21  ;;  %881 = vmatprep.mubr.bf16.mxu0 %v191_v49  ;;  %v2071_v59 = vld [vmem:[#allocation5 + $0x1a0] ss:$8 sps:$4 sm:$0xff]   ;;  %v2074_v61 = vld [vmem:[#allocation5 + $0x194] ss:$8 sps:$4 sm:$0xff]   ;;  %v2076_v62 = vld [vmem:[#allocation5 + $0x90] ss:$8 sps:$4 sm:$0xff]  }
  0x3b   :  { %922 = vmatprep.mubr.bf16.mxu1 %v193_v52  ;;  %v2077_v63 = vld [vmem:[#allocation5 + $0x190] ss:$8 sps:$4 sm:$0xff]   ;;  %v2078_v0 = vld [vmem:[#allocation5 + $0x84] ss:$8 sps:$4 sm:$0xff]   ;;  %v2082_v2 = vld [vmem:[#allocation5 + $0x80] ss:$8 sps:$4 sm:$0xff]  }
  0x3c   :  { %860 = vmatpush1.bf16.msra.mxu0 %v2022_v22  ;;  %v2080_v1 = vld [vmem:[#allocation5 + $0x184] ss:$8 sps:$4 sm:$0xff]   ;;  %v2083_v3 = vld [vmem:[#allocation5 + $0x180] ss:$8 sps:$4 sm:$0xff]   ;;  %v55_v5 = vld [vmem:[#allocation2 + $0x10] sm:$0xff]  ;;  %s1651_s2 = sshll.u32 %s2321_s0, 4  ;;  %s1652_s2 = int_to_ptr.vmem [resolvable:$true] %s1651_s2 }
  0x3d   :  { %901 = vmatpush1.bf16.msra.mxu1 %v2023_v23  ;;  %861 = vmatprep.subr.bf16.mxu0 %v2024_v24  ;;  %v2086_v6 = vld [vmem:[#allocation5 + $0x274] ss:$8 sps:$4 sm:$0xff]   ;;  %v192_v9 = vpack.c.bf16 %v55_v5, %v55_v5  ;;  %v2084_v10 = vld [vmem:[#allocation5 + $0x270] ss:$8 sps:$4 sm:$0xff]   ;;  %v2092_v12 = vld [vmem:[#allocation5 + $0x264] ss:$8 sps:$4 sm:$0xff]   ;;  %p2293_p2 = scmp.lt.s32.totalorder %s1652_s2, %s1652_s2 }
  0x3e   :  { %902 = vmatprep.subr.bf16.mxu1 %v2026_v25  ;;  %v2089_v7 = vld [vmem:[#allocation5 + $0x374] ss:$8 sps:$4 sm:$0xff]   ;;  %v2087_v11 = vld [vmem:[#allocation5 + $0x370] ss:$8 sps:$4 sm:$0xff]   ;;  %v2095_v13 = vld [vmem:[#allocation5 + $0x364] ss:$8 sps:$4 sm:$0xff]  }
  0x3f   :  { %v2090_v14 = vld [vmem:[#allocation5 + $0x260] ss:$8 sps:$4 sm:$0xff]   ;;  %v2098_v16 = vld [vmem:[#allocation5 + $0x254] ss:$8 sps:$4 sm:$0xff]   ;;  %v2096_v18 = vld [vmem:[#allocation5 + $0x250] ss:$8 sps:$4 sm:$0xff]  }
  0x40   :  { %862 = vmatpush1.bf16.msra.mxu0 %v2028_v26  ;;  %v2093_v15 = vld [vmem:[#allocation5 + $0x360] ss:$8 sps:$4 sm:$0xff]   ;;  %v2101_v17 = vld [vmem:[#allocation5 + $0x354] ss:$8 sps:$4 sm:$0xff]   ;;  %v2099_v19 = vld [vmem:[#allocation5 + $0x350] ss:$8 sps:$4 sm:$0xff]  }
  0x41   :  { %903 = vmatpush1.bf16.msra.mxu1 %v2029_v27  ;;  %863 = vmatprep.subr.bf16.mxu0 %v2030_v28  ;;  %v2104_v20 = vld [vmem:[#allocation5 + $0x244] ss:$8 sps:$4 sm:$0xff]   ;;  %v2102_v22 = vld [vmem:[#allocation5 + $0x240] ss:$8 sps:$4 sm:$0xff]   ;;  %v2110_v24 = vld [vmem:[#allocation5 + $0x234] ss:$8 sps:$4 sm:$0xff]  }
  0x42   :  { %904 = vmatprep.subr.bf16.mxu1 %v2032_v29  ;;  %v2107_v21 = vld [vmem:[#allocation5 + $0x344] ss:$8 sps:$4 sm:$0xff]   ;;  %v2105_v23 = vld [vmem:[#allocation5 + $0x340] ss:$8 sps:$4 sm:$0xff]   ;;  %v2113_v25 = vld [vmem:[#allocation5 + $0x334] ss:$8 sps:$4 sm:$0xff]  }
  0x43   :  { %v2108_v26 = vld [vmem:[#allocation5 + $0x230] ss:$8 sps:$4 sm:$0xff]   ;;  %v2116_v28 = vld [vmem:[#allocation5 + $0x224] ss:$8 sps:$4 sm:$0xff]   ;;  %v2138_v50 = vld [vmem:[#allocation5 + $0x2e0] ss:$8 sps:$4 sm:$0xff]  }
  0x44   :  { %864 = vmatpush1.bf16.msra.mxu0 %v2034_v30  ;;  %v2111_v27 = vld [vmem:[#allocation5 + $0x330] ss:$8 sps:$4 sm:$0xff]   ;;  %v2119_v29 = vld [vmem:[#allocation5 + $0x324] ss:$8 sps:$4 sm:$0xff]   ;;  %v2114_v30 = vld [vmem:[#allocation5 + $0x220] ss:$8 sps:$4 sm:$0xff]  }
  0x45   :  { %905 = vmatpush1.bf16.msra.mxu1 %v2035_v31  ;;  %865 = vmatprep.subr.bf16.mxu0 %v2036_v32  ;;  %v2117_v31 = vld [vmem:[#allocation5 + $0x320] ss:$8 sps:$4 sm:$0xff]   ;;  %v2122_v32 = vld [vmem:[#allocation5 + $0x214] ss:$8 sps:$4 sm:$0xff]   ;;  %v2132_v46 = vld [vmem:[#allocation5 + $0x2f0] ss:$8 sps:$4 sm:$0xff]  }
  0x46   :  { %906 = vmatprep.subr.bf16.mxu1 %v2038_v33  ;;  %v2125_v33 = vld [vmem:[#allocation5 + $0x314] ss:$8 sps:$4 sm:$0xff]   ;;  %v2143_v49 = vld [vmem:[#allocation5 + $0x3e4] ss:$8 sps:$4 sm:$0xff]   ;;  %s2288_s29 = scalar_lea.vmem %s1652_s2, 128 }
  0x47   :  { %v2146_v52 = vld [vmem:[#allocation5 + $0x2d4] ss:$8 sps:$4 sm:$0xff]   ;;  %p2289_p1 = scmp.ne.s32.totalorder %s1652_s2, %s2288_s29  ;;  %p2294_p3 = scmp.lt.s32.totalorder %s2288_s29, %s2288_s29 }
  0x48   :  { %866 = vmatpush2.bf16.msra.mxu0 %v2040_v34  ;;  %v2120_v34 = vld [vmem:[#allocation5 + $0x210] ss:$8 sps:$4 sm:$0xff]   ;;  %v2170_v4 = vld [vmem:[#allocation5 + $0x294] ss:$8 sps:$4 sm:$0xff]  }
  0x49   :  { %907 = vmatpush2.bf16.msra.mxu1 %v2041_v35  ;;  %867 = vmatprep.subr.bf16.mxu0 %v2042_v36  ;;  %v58_v35 = vld [vmem:[#allocation2 + $0x28] sm:$0xff]  ;;  %v2123_v36 = vld [vmem:[#allocation5 + $0x310] ss:$8 sps:$4 sm:$0xff]   ;;  %v2173_v5 = vld [vmem:[#allocation5 + $0x394] ss:$8 sps:$4 sm:$0xff]   ;;  %p2295_p4 = por %p2294_p3, %p2293_p2 }
  0x4a   :  { %908 = vmatprep.subr.bf16.mxu1 %v2044_v37  ;;  %v2128_v37 = vld [vmem:[#allocation5 + $0x204] ss:$8 sps:$4 sm:$0xff]  }
  0x4b   :  { %p2296_p5 = pnand %p2295_p4, %p2289_p1 }
  0x4c   :  { %868 = vmatpush2.bf16.msra.mxu0 %v2046_v38  ;;  %v195_v38 = vpack.c.bf16 %v58_v35, %v58_v35  ;;  %v2198_v35 = vld [vmem:[#allocation5 + $0x550] ss:$8 sps:$4 sm:$0xff]  }
  0x4d   :  { %909 = vmatpush2.bf16.msra.mxu1 %v2047_v39  ;;  %869 = vmatprep.subr.bf16.mxu0 %v2048_v40  ;;  %v60_v39 = vld [vmem:[#allocation2 + $0x38] sm:$0xff]  ;;  %v2131_v40 = vld [vmem:[#allocation5 + $0x304] ss:$8 sps:$4 sm:$0xff]  }
  0x4e   :  { %910 = vmatprep.subr.bf16.mxu1 %v2050_v41  ;;  %v197_v41 = vpack.c.bf16 %v60_v39, %v60_v39 }
  0x50   :  { %870 = vmatpush2.bf16.msra.mxu0 %v2052_v42  ;;  %v2126_v42 = vld [vmem:[#allocation5 + $0x200] ss:$8 sps:$4 sm:$0xff]  }
  0x51   :  { %911 = vmatpush2.bf16.msra.mxu1 %v2053_v43  ;;  %871 = vmatprep.subr.bf16.mxu0 %v2054_v44  ;;  %v2129_v43 = vld [vmem:[#allocation5 + $0x300] ss:$8 sps:$4 sm:$0xff]   ;;  %v2134_v44 = vld [vmem:[#allocation5 + $0x2f4] ss:$8 sps:$4 sm:$0xff]  }
  0x52   :  { %912 = vmatprep.subr.bf16.mxu1 %v2056_v45  ;;  %v2137_v45 = vld [vmem:[#allocation5 + $0x3f4] ss:$8 sps:$4 sm:$0xff]  }
  0x54   :  { %872 = vmatpush2.bf16.msra.mxu0 %v2058_v47  ;;  %v2135_v47 = vld [vmem:[#allocation5 + $0x3f0] ss:$8 sps:$4 sm:$0xff]  }
  0x55   :  { %913 = vmatpush2.bf16.msra.mxu1 %v2059_v48  ;;  %873 = vmatprep.subr.bf16.mxu0 %v2060_v51  ;;  %v2140_v48 = vld [vmem:[#allocation5 + $0x2e4] ss:$8 sps:$4 sm:$0xff]   ;;  %v2141_v51 = vld [vmem:[#allocation5 + $0x3e0] ss:$8 sps:$4 sm:$0xff]  }
  0x56   :  { %914 = vmatprep.subr.bf16.mxu1 %v2062_v53  ;;  %v2149_v53 = vld [vmem:[#allocation5 + $0x3d4] ss:$8 sps:$4 sm:$0xff]  }
  0x58   :  { %874 = vmatpush2.bf16.msra.mxu0 %v2064_v54  ;;  %v2144_v54 = vld [vmem:[#allocation5 + $0x2d0] ss:$8 sps:$4 sm:$0xff]  }
  0x59   :  { %915 = vmatpush2.bf16.msra.mxu1 %v2065_v55  ;;  %875 = vmatprep.subr.bf16.mxu0 %v2066_v56  ;;  %v2147_v55 = vld [vmem:[#allocation5 + $0x3d0] ss:$8 sps:$4 sm:$0xff]   ;;  %v2152_v56 = vld [vmem:[#allocation5 + $0x2c4] ss:$8 sps:$4 sm:$0xff]  }
  0x5a   :  { %916 = vmatprep.subr.bf16.mxu1 %v2068_v57  ;;  %v2155_v57 = vld [vmem:[#allocation5 + $0x3c4] ss:$8 sps:$4 sm:$0xff]  }
  0x5c   :  { %876 = vmatpush2.bf16.msra.mxu0 %v2070_v58  ;;  %v2150_v58 = vld [vmem:[#allocation5 + $0x2c0] ss:$8 sps:$4 sm:$0xff]  }
  0x5d   :  { %917 = vmatpush2.bf16.msra.mxu1 %v2071_v59  ;;  %877 = vmatprep.subr.bf16.mxu0 %v2072_v60  ;;  %v2153_v59 = vld [vmem:[#allocation5 + $0x3c0] ss:$8 sps:$4 sm:$0xff]   ;;  %v2158_v60 = vld [vmem:[#allocation5 + $0x2b4] ss:$8 sps:$4 sm:$0xff]  }
  0x5e   :  { %918 = vmatprep.subr.bf16.mxu1 %v2074_v61  ;;  %v2161_v61 = vld [vmem:[#allocation5 + $0x3b4] ss:$8 sps:$4 sm:$0xff]  }
  0x60   :  { %878 = vmatpush2.bf16.msra.mxu0 %v2076_v62  ;;  %v2156_v62 = vld [vmem:[#allocation5 + $0x2b0] ss:$8 sps:$4 sm:$0xff]  }
  0x61   :  { %919 = vmatpush2.bf16.msra.mxu1 %v2077_v63  ;;  %879 = vmatprep.subr.bf16.mxu0 %v2078_v0  ;;  %v2159_v63 = vld [vmem:[#allocation5 + $0x3b0] ss:$8 sps:$4 sm:$0xff]   ;;  %v2164_v0 = vld [vmem:[#allocation5 + $0x2a4] ss:$8 sps:$4 sm:$0xff]  }
  0x62   :  { %920 = vmatprep.subr.bf16.mxu1 %v2080_v1  ;;  %v2167_v1 = vld [vmem:[#allocation5 + $0x3a4] ss:$8 sps:$4 sm:$0xff]  }
  0x64   :  { %880 = vmatpush2.bf16.msra.mxu0 %v2082_v2  ;;  %v2162_v2 = vld [vmem:[#allocation5 + $0x2a0] ss:$8 sps:$4 sm:$0xff]  }
  0x65   :  { %921 = vmatpush2.bf16.msra.mxu1 %v2083_v3  ;;  %931 = vmatprep.subr.bf16.mxu0 %v2086_v6  ;;  %v2165_v3 = vld [vmem:[#allocation5 + $0x3a0] ss:$8 sps:$4 sm:$0xff]   ;;  %v2168_v6 = vld [vmem:[#allocation5 + $0x290] ss:$8 sps:$4 sm:$0xff]  }
  0x66   :  { %972 = vmatprep.subr.bf16.mxu1 %v2089_v7  ;;  %v2171_v7 = vld [vmem:[#allocation5 + $0x390] ss:$8 sps:$4 sm:$0xff]  }
  0x67   :  { %882 = vmatmul.mubr.bf16.vlgmr.msra.gmra.mxu0 %v190_v8  ;;  %v2176_v8 = vld [vmem:[#allocation5 + $0x284] ss:$8 sps:$4 sm:$0xff]  }
  0x68   :  { %923 = vmatmul.mubr.bf16.vlgmr.msra.gmra.mxu1 %v192_v9  ;;  %932 = vmatpush1.bf16.msra.mxu0 %v2084_v10  ;;  %v2179_v9 = vld [vmem:[#allocation5 + $0x384] ss:$8 sps:$4 sm:$0xff]   ;;  %v2174_v10 = vld [vmem:[#allocation5 + $0x280] ss:$8 sps:$4 sm:$0xff]  }
  0x69   :  { %973 = vmatpush1.bf16.msra.mxu1 %v2087_v11  ;;  %933 = vmatprep.subr.bf16.mxu0 %v2092_v12  ;;  %v2177_v11 = vld [vmem:[#allocation5 + $0x380] ss:$8 sps:$4 sm:$0xff]  }
  0x6a   :  { %974 = vmatprep.subr.bf16.mxu1 %v2095_v13  ;;  %963 = vmatprep.mubr.bf16.mxu0 %v195_v38  ;;  %v57_v12 = vld [vmem:[#allocation2 + $0x20] sm:$0xff]  ;;  %v59_v13 = vld [vmem:[#allocation2 + $0x30] sm:$0xff] }
  0x6b   :  { %1004 = vmatprep.mubr.bf16.mxu1 %v197_v41 }
  0x6c   :  { %934 = vmatpush1.bf16.msra.mxu0 %v2090_v14  ;;  %v194_v14 = vpack.c.bf16 %v57_v12, %v57_v12  ;;  %v2204_v12 = vld [vmem:[#allocation5 + $0x5f0] ss:$8 sps:$4 sm:$0xff]  }
  0x6d   :  { %975 = vmatpush1.bf16.msra.mxu1 %v2093_v15  ;;  %935 = vmatprep.subr.bf16.mxu0 %v2098_v16  ;;  %v196_v15 = vpack.c.bf16 %v59_v13, %v59_v13  ;;  %v2180_v16 = vld [vmem:[#allocation5 + $0x4f0] ss:$8 sps:$4 sm:$0xff]   ;;  %v2205_v13 = vld [vmem:[#allocation5 + $0x5e0] ss:$8 sps:$4 sm:$0xff]  }
  0x6e   :  { %976 = vmatprep.subr.bf16.mxu1 %v2101_v17  ;;  %v2181_v17 = vld [vmem:[#allocation5 + $0x470] ss:$8 sps:$4 sm:$0xff]  }
  0x70   :  { %936 = vmatpush1.bf16.msra.mxu0 %v2096_v18  ;;  %v2182_v18 = vld [vmem:[#allocation5 + $0x4e0] ss:$8 sps:$4 sm:$0xff]  }
  0x71   :  { %977 = vmatpush1.bf16.msra.mxu1 %v2099_v19  ;;  %937 = vmatprep.subr.bf16.mxu0 %v2104_v20  ;;  %v2183_v19 = vld [vmem:[#allocation5 + $0x460] ss:$8 sps:$4 sm:$0xff]   ;;  %v2184_v20 = vld [vmem:[#allocation5 + $0x4d0] ss:$8 sps:$4 sm:$0xff]  }
  0x72   :  { %978 = vmatprep.subr.bf16.mxu1 %v2107_v21  ;;  %v2185_v21 = vld [vmem:[#allocation5 + $0x450] ss:$8 sps:$4 sm:$0xff]  }
  0x74   :  { %938 = vmatpush1.bf16.msra.mxu0 %v2102_v22  ;;  %v2186_v22 = vld [vmem:[#allocation5 + $0x4c0] ss:$8 sps:$4 sm:$0xff]  }
  0x75   :  { %979 = vmatpush1.bf16.msra.mxu1 %v2105_v23  ;;  %939 = vmatprep.subr.bf16.mxu0 %v2110_v24  ;;  %v2187_v23 = vld [vmem:[#allocation5 + $0x440] ss:$8 sps:$4 sm:$0xff]   ;;  %v2188_v24 = vld [vmem:[#allocation5 + $0x4b0] ss:$8 sps:$4 sm:$0xff]  }
  0x76   :  { %980 = vmatprep.subr.bf16.mxu1 %v2113_v25  ;;  %v2189_v25 = vld [vmem:[#allocation5 + $0x430] ss:$8 sps:$4 sm:$0xff]  }
  0x78   :  { %940 = vmatpush1.bf16.msra.mxu0 %v2108_v26  ;;  %v2190_v26 = vld [vmem:[#allocation5 + $0x4a0] ss:$8 sps:$4 sm:$0xff]  }
  0x79   :  { %981 = vmatpush1.bf16.msra.mxu1 %v2111_v27  ;;  %941 = vmatprep.subr.bf16.mxu0 %v2116_v28  ;;  %v2191_v27 = vld [vmem:[#allocation5 + $0x420] ss:$8 sps:$4 sm:$0xff]   ;;  %v2192_v28 = vld [vmem:[#allocation5 + $0x490] ss:$8 sps:$4 sm:$0xff]  }
  0x7a   :  { %982 = vmatprep.subr.bf16.mxu1 %v2119_v29  ;;  %v2193_v29 = vld [vmem:[#allocation5 + $0x410] ss:$8 sps:$4 sm:$0xff]  }
  0x7c   :  { %942 = vmatpush1.bf16.msra.mxu0 %v2114_v30  ;;  %v2194_v30 = vld [vmem:[#allocation5 + $0x480] ss:$8 sps:$4 sm:$0xff]  }
  0x7d   :  { %983 = vmatpush1.bf16.msra.mxu1 %v2117_v31  ;;  %943 = vmatprep.subr.bf16.mxu0 %v2122_v32  ;;  %v2195_v31 = vld [vmem:[#allocation5 + $0x400] ss:$8 sps:$4 sm:$0xff]   ;;  %v2196_v32 = vld [vmem:[#allocation5 + $0x570] ss:$8 sps:$4 sm:$0xff]  }
  0x7e   :  { %984 = vmatprep.subr.bf16.mxu1 %v2125_v33  ;;  %v2319_v33 = vmov 0.0  }
  0x80   :  { %944 = vmatpush1.bf16.msra.mxu0 %v2120_v34  ;;  %v2197_v34 = vld [vmem:[#allocation5 + $0x560] ss:$8 sps:$4 sm:$0xff]  }
  0x81   :  { %985 = vmatpush1.bf16.msra.mxu1 %v2123_v36  ;;  %945 = vmatprep.subr.bf16.mxu0 %v2128_v37  ;;  %v2199_v36 = vld [vmem:[#allocation5 + $0x540] ss:$8 sps:$4 sm:$0xff]   ;;  %v2200_v37 = vld [vmem:[#allocation5 + $0x530] ss:$8 sps:$4 sm:$0xff]  }
  0x82   :  { %986 = vmatprep.subr.bf16.mxu1 %v2131_v40 }
  0x84   :  { %946 = vmatpush1.bf16.msra.mxu0 %v2126_v42 }
  0x85   :  { %987 = vmatpush1.bf16.msra.mxu1 %v2129_v43  ;;  %947 = vmatprep.subr.bf16.mxu0 %v2134_v44 }
  0x86   :  { %988 = vmatprep.subr.bf16.mxu1 %v2137_v45 }
  0x88   :  { %948 = vmatpush2.bf16.msra.mxu0 %v2132_v46  ;;  %v199_v46 = vlaneseq }
  0x89   :  { %989 = vmatpush2.bf16.msra.mxu1 %v2135_v47  ;;  %949 = vmatprep.subr.bf16.mxu0 %v2140_v48 }
  0x8a   :  { %990 = vmatprep.subr.bf16.mxu1 %v2143_v49  ;;  %v200_v47 = vshrl.u32 %v199_v46, 7  ;;  %v189_v49 = vld [vmem:[#allocation7] sm:$0x3]  ;;  %v2220_v46 = vld [vmem:[#allocation5 + $0x6f0] ss:$8 sps:$4 sm:$0xff]  }
  0x8c   :  { %950 = vmatpush2.bf16.msra.mxu0 %v2138_v50  ;;  %v201_v48 = vsub.s32 0, %v200_v47  ;;  %v205_v50 = vsub.s32 1, %v200_v47  ;;  %v2221_v47 = vld [vmem:[#allocation5 + $0x6e0] ss:$8 sps:$4 sm:$0xff]  }
  0x8d   :  { %991 = vmatpush2.bf16.msra.mxu1 %v2141_v51  ;;  %951 = vmatprep.subr.bf16.mxu0 %v2146_v52 }
  0x8e   :  { %992 = vmatprep.subr.bf16.mxu1 %v2149_v53  ;;  %v202_v51 = vrot.slane %v189_v49, %v201_v48  ;;  %v206_v52 = vrot.slane %v189_v49, %v205_v50  ;;  %v2222_v48 = vld [vmem:[#allocation5 + $0x6d0] ss:$8 sps:$4 sm:$0xff]   ;;  %v2223_v49 = vld [vmem:[#allocation5 + $0x6c0] ss:$8 sps:$4 sm:$0xff]  }
  0x8f   :  { %v2224_v50 = vld [vmem:[#allocation5 + $0x6b0] ss:$8 sps:$4 sm:$0xff]  }
  0x90   :  { %952 = vmatpush2.bf16.msra.mxu0 %v2144_v54 }
  0x91   :  { %993 = vmatpush2.bf16.msra.mxu1 %v2147_v55  ;;  %953 = vmatprep.subr.bf16.mxu0 %v2152_v56 }
  0x92   :  { %994 = vmatprep.subr.bf16.mxu1 %v2155_v57 }
  0x94   :  { %954 = vmatpush2.bf16.msra.mxu0 %v2150_v58 }
  0x95   :  { %995 = vmatpush2.bf16.msra.mxu1 %v2153_v59  ;;  %955 = vmatprep.subr.bf16.mxu0 %v2158_v60 }
  0x96   :  { %996 = vmatprep.subr.bf16.mxu1 %v2161_v61 }
  0x98   :  { %956 = vmatpush2.bf16.msra.mxu0 %v2156_v62 }
  0x99   :  { %997 = vmatpush2.bf16.msra.mxu1 %v2159_v63  ;;  %957 = vmatprep.subr.bf16.mxu0 %v2164_v0 }
  0x9a   :  { %998 = vmatprep.subr.bf16.mxu1 %v2167_v1 }
  0x9c   :  { %958 = vmatpush2.bf16.msra.mxu0 %v2162_v2 }
  0x9d   :  { %999 = vmatpush2.bf16.msra.mxu1 %v2165_v3  ;;  %959 = vmatprep.subr.bf16.mxu0 %v2170_v4 }
  0x9e   :  { %1000 = vmatprep.subr.bf16.mxu1 %v2173_v5 }
  0xa0   :  { %960 = vmatpush2.bf16.msra.mxu0 %v2168_v6 }
  0xa1   :  { %1001 = vmatpush2.bf16.msra.mxu1 %v2171_v7  ;;  %961 = vmatprep.subr.bf16.mxu0 %v2176_v8 }
  0xa2   :  { %1002 = vmatprep.subr.bf16.mxu1 %v2179_v9  ;;  %v2201_v9 = vld [vmem:[#allocation5 + $0x520] ss:$8 sps:$4 sm:$0xff]  }
  0xa4   :  { %962 = vmatpush2.bf16.msra.mxu0 %v2174_v10  ;;  %v2202_v10 = vld [vmem:[#allocation5 + $0x510] ss:$8 sps:$4 sm:$0xff]  }
  0xa5   :  { %1003 = vmatpush2.bf16.msra.mxu1 %v2177_v11  ;;  %1842 = vmatprep.subr.bf16.mxu0 %v2180_v16  ;;  %v2203_v11 = vld [vmem:[#allocation5 + $0x500] ss:$8 sps:$4 sm:$0xff]   ;;  %v2208_v16 = vld [vmem:[#allocation5 + $0x5b0] ss:$8 sps:$4 sm:$0xff]  }
  0xa6   :  { %1900 = vmatprep.subr.bf16.mxu1 %v2319_v33 }
  0xa7   :  { %964 = vmatmul.mubr.bf16.vlgmr.msra.gmra.mxu0 %v194_v14  ;;  %v2206_v14 = vld [vmem:[#allocation5 + $0x5d0] ss:$8 sps:$4 sm:$0xff]  }
  0xa8   :  { %1005 = vmatmul.mubr.bf16.vlgmr.msra.gmra.mxu1 %v196_v15  ;;  %1843 = vmatpush3.bf16.msra.mxu0 %v2181_v17  ;;  %v2207_v15 = vld [vmem:[#allocation5 + $0x5c0] ss:$8 sps:$4 sm:$0xff]  }
  0xa9   :  { %1844 = vmatprep.subr.bf16.mxu0 %v2182_v18  ;;  %1901 = vmatpush3.bf16.msra.mxu1 %v2196_v32  ;;  %v2209_v17 = vld [vmem:[#allocation5 + $0x5a0] ss:$8 sps:$4 sm:$0xff]  }
  0xaa   :  { %1902 = vmatprep.subr.bf16.mxu1 %v2319_v33  ;;  %1916 = vmatprep.mubr.msk.bf16.mxu1 %vm2320_vm0, %v2319_v33  ;;  %v2215_v32 = vld [vmem:[#allocation5 + $0x640] ss:$8 sps:$4 sm:$0xff]  }
  0xac   :  { %1845 = vmatpush3.bf16.msra.mxu0 %v2183_v19  ;;  %v1789_v19 = vld [vmem:[#allocation7 + $0x2] ss:$0 sm:$0xff] }
  0xad   :  { %1846 = vmatprep.subr.bf16.mxu0 %v2184_v20  ;;  %1903 = vmatpush3.bf16.msra.mxu1 %v2197_v34  ;;  %v2216_v34 = vld [vmem:[#allocation5 + $0x630] ss:$8 sps:$4 sm:$0xff]  }
  0xae   :  { %1904 = vmatprep.subr.bf16.mxu1 %v2319_v33 }
  0xb0   :  { %1847 = vmatpush3.bf16.msra.mxu0 %v2185_v21 }
  0xb1   :  { %1848 = vmatprep.subr.bf16.mxu0 %v2186_v22  ;;  %1905 = vmatpush3.bf16.msra.mxu1 %v2198_v35  ;;  %v2217_v35 = vld [vmem:[#allocation5 + $0x620] ss:$8 sps:$4 sm:$0xff]  }
  0xb2   :  { %1906 = vmatprep.subr.bf16.mxu1 %v2319_v33 }
  0xb4   :  { %1849 = vmatpush3.bf16.msra.mxu0 %v2187_v23 }
  0xb5   :  { %1850 = vmatprep.subr.bf16.mxu0 %v2188_v24  ;;  %1907 = vmatpush3.bf16.msra.mxu1 %v2199_v36  ;;  %v1806_v36 = vld [vmem:[#allocation7 + $0x3] ss:$0 sm:$0xff] }
  0xb6   :  { %1908 = vmatprep.subr.bf16.mxu1 %v2319_v33 }
  0xb8   :  { %1851 = vmatpush3.bf16.msra.mxu0 %v2189_v25 }
  0xb9   :  { %1852 = vmatprep.subr.bf16.mxu0 %v2190_v26  ;;  %1909 = vmatpush3.bf16.msra.mxu1 %v2200_v37 }
  0xba   :  { %1910 = vmatprep.subr.bf16.mxu1 %v2319_v33 }
  0xbc   :  { %1853 = vmatpush3.bf16.msra.mxu0 %v2191_v27  ;;  %v2210_v27 = vld [vmem:[#allocation5 + $0x590] ss:$8 sps:$4 sm:$0xff]  }
  0xbd   :  { %1854 = vmatprep.subr.bf16.mxu0 %v2192_v28  ;;  %1911 = vmatpush3.bf16.msra.mxu1 %v2201_v9  ;;  %v2211_v28 = vld [vmem:[#allocation5 + $0x580] ss:$8 sps:$4 sm:$0xff]  }
  0xbe   :  { %1912 = vmatprep.subr.bf16.mxu1 %v2319_v33 }
  0xc0   :  { %1855 = vmatpush3.bf16.msra.mxu0 %v2193_v29  ;;  %v2212_v29 = vld [vmem:[#allocation5 + $0x670] ss:$8 sps:$4 sm:$0xff]  }
  0xc1   :  { %1856 = vmatprep.subr.bf16.mxu0 %v2194_v30  ;;  %1913 = vmatpush3.bf16.msra.mxu1 %v2202_v10  ;;  %v2213_v30 = vld [vmem:[#allocation5 + $0x660] ss:$8 sps:$4 sm:$0xff]  }
  0xc2   :  { %1914 = vmatprep.subr.bf16.mxu1 %v2319_v33 }
  0xc4   :  { %1857 = vmatpush3.bf16.msra.mxu0 %v2195_v31  ;;  %v2214_v31 = vld [vmem:[#allocation5 + $0x650] ss:$8 sps:$4 sm:$0xff]  }
  0xc5   :  { %1920 = vmatprep.subr.bf16.mxu0 %v2319_v33  ;;  %1915 = vmatpush3.bf16.msra.mxu1 %v2203_v11 }
  0xc6   :  { %1940 = vmatprep.subr.bf16.mxu1 %v2319_v33 }
 0x127   :  { %v883_v38 = vpop.f32.mrf.mxu0 }
 0x128   :  { %v924_v39 = vpop.f32.mrf.mxu1  ;;  %v884_v53 = vadd.f32 %v883_v38, %v202_v51  ;;  %v2225_v51 = vld [vmem:[#allocation5 + $0x6a0] ss:$8 sps:$4 sm:$0xff]  }
 0x129   :  { %v885_v40 = vpop.f32.mrf.mxu0 }
 0x12a   :  { %v926_v41 = vpop.f32.mrf.mxu1  ;;  %v886_v54 = vadd.f32 %v885_v40, %v206_v52  ;;  %v925_v55 = vadd.f32 %v924_v39, %v884_v53  ;;  %v1815_v52 = vld [vmem:[#allocation7 + $0x4] ss:$0 sm:$0xff] }
 0x12b   :  { %v887_v42 = vpop.f32.mrf.mxu0 }
 0x12c   :  { %v928_v43 = vpop.f32.mrf.mxu1  ;;  %v927_v58 = vadd.f32 %v926_v41, %v886_v54 }
 0x12d   :  { %v888_v44 = vpop.f32.mrf.mxu0 }
 0x12e   :  { %v929_v45 = vpop.f32.mrf.mxu1  ;;  %v2218_v44 = vld [vmem:[#allocation5 + $0x610] ss:$8 sps:$4 sm:$0xff]  }
 0x12f   :  { %v2219_v45 = vld [vmem:[#allocation5 + $0x600] ss:$8 sps:$4 sm:$0xff]  }
 0x167   :  { %v965_v56 = vpop.f32.mrf.mxu0 }
 0x168   :  { %v1006_v57 = vpop.f32.mrf.mxu1  ;;  %v966_v59 = vadd.f32 %v965_v56, %v925_v55 }
 0x169   :  { %v967_v60 = vpop.f32.mrf.mxu0 }
 0x16a   :  { %v1008_v61 = vpop.f32.mrf.mxu1  ;;  %v1007_v62 = vadd.f32 %v1006_v57, %v966_v59  ;;  %v968_v63 = vadd.f32 %v967_v60, %v927_v58  ;;  %v2226_v60 = vld [vmem:[#allocation5 + $0x690] ss:$8 sps:$4 sm:$0xff]  }
 0x16b   :  { %v969_v0 = vpop.f32.mrf.mxu0 }
 0x16c   :  { %v1010_v1 = vpop.f32.mrf.mxu1  ;;  %v1009_v2 = vadd.f32 %v1008_v61, %v968_v63  ;;  %v1013_v3 = vmax.f32 %v1007_v62, 0.0  ;;  %v2227_v61 = vld [vmem:[#allocation5 + $0x680] ss:$8 sps:$4 sm:$0xff]   ;;  %v1824_v62 = vld [vmem:[#allocation7 + $0x5] ss:$0 sm:$0xff] }
 0x16d   :  { %v970_v4 = vpop.f32.mrf.mxu0 }
 0x16e   :  { %v1011_v5 = vpop.f32.mrf.mxu1  ;;  %v1014_v6 = vmax.f32 %v1009_v2, 0.0  ;;  %v1048_v8 = vpack.c.bf16 %v1013_v3, %v1013_v3 }
 0x170   :  { %v1049_v7 = vpack.c.bf16 %v1014_v6, %v1014_v6  ;;  %v1833_v6 = vld [vmem:[#allocation7 + $0x6] ss:$0 sm:$0xff] }
 0x172   :  { %1184 = vmatprep.mubr.bf16.mxu0 %v1049_v7 }
 0x173   :  { %1185 = vmatmul.mubr.bf16.vlgmr.msra.gmra.mxu0 %v1048_v8 }
 0x174   :  { %1936 = vmatprep.mubr.msk.bf16.mxu0 %vm2320_vm0, %v2319_v33  ;;  %1921 = vmatpush3.bf16.msra.mxu0 %v2204_v12 }
 0x175   :  { %1922 = vmatprep.subr.bf16.mxu0 %v2319_v33 }
 0x178   :  { %1923 = vmatpush3.bf16.msra.mxu0 %v2205_v13 }
 0x179   :  { %1924 = vmatprep.subr.bf16.mxu0 %v2319_v33 }
 0x17c   :  { %1925 = vmatpush3.bf16.msra.mxu0 %v2206_v14 }
 0x17d   :  { %1926 = vmatprep.subr.bf16.mxu0 %v2319_v33 }
 0x180   :  { %1927 = vmatpush3.bf16.msra.mxu0 %v2207_v15 }
 0x181   :  { %1928 = vmatprep.subr.bf16.mxu0 %v2319_v33 }
 0x184   :  { %1929 = vmatpush3.bf16.msra.mxu0 %v2208_v16 }
 0x185   :  { %1930 = vmatprep.subr.bf16.mxu0 %v2319_v33 }
 0x188   :  { %1931 = vmatpush3.bf16.msra.mxu0 %v2209_v17 }
 0x189   :  { %1932 = vmatprep.subr.bf16.mxu0 %v2319_v33 }
 0x18c   :  { %1933 = vmatpush3.bf16.msra.mxu0 %v2210_v27 }
 0x18d   :  { %1934 = vmatprep.subr.bf16.mxu0 %v2319_v33 }
 0x190   :  { %1935 = vmatpush3.bf16.msra.mxu0 %v2211_v28 }
 0x191   :  { %1960 = vmatprep.subr.bf16.mxu0 %v2319_v33 }
 0x233   :  { %v1858_v18 = vpop.f32.mrf.mxu0 }
 0x235   :  { %v1859_v20 = vpop.f32.mrf.mxu0 }
 0x236   :  { %v1860_v21 = vadd.f32 %v1859_v20, %v1858_v18 }
 0x237   :  { %v1861_v22 = vpop.f32.mrf.mxu0 }
 0x238   :  { %v1187_v23 = vadd.f32 %v1860_v21, %v1789_v19 }
 0x239   :  { %v1862_v24 = vpop.f32.mrf.mxu0 }
 0x23a   :  { %v1192_v25 = vmax.f32 %v1187_v23, 0.0 }
 0x23c   :  { %v1210_v26 = vpack.c.bf16 %v1192_v25, %v1192_v25 }
 0x23e   :  { %1917 = vmatmul.mubr.bf16.vlgmr.msra.gmra.mxu1 %v1210_v26 }
 0x23f   :  { %1956 = vmatprep.mubr.msk.bf16.mxu1 %vm2320_vm0, %v2319_v33  ;;  %1941 = vmatpush3.bf16.msra.mxu1 %v2212_v29 }
 0x240   :  { %1942 = vmatprep.subr.bf16.mxu1 %v2319_v33 }
 0x243   :  { %1943 = vmatpush3.bf16.msra.mxu1 %v2213_v30 }
 0x244   :  { %1944 = vmatprep.subr.bf16.mxu1 %v2319_v33 }
 0x247   :  { %1945 = vmatpush3.bf16.msra.mxu1 %v2214_v31 }
 0x248   :  { %1946 = vmatprep.subr.bf16.mxu1 %v2319_v33 }
 0x24b   :  { %1947 = vmatpush3.bf16.msra.mxu1 %v2215_v32 }
 0x24c   :  { %1948 = vmatprep.subr.bf16.mxu1 %v2319_v33 }
 0x24f   :  { %1949 = vmatpush3.bf16.msra.mxu1 %v2216_v34 }
 0x250   :  { %1950 = vmatprep.subr.bf16.mxu1 %v2319_v33 }
 0x253   :  { %1951 = vmatpush3.bf16.msra.mxu1 %v2217_v35 }
 0x254   :  { %1952 = vmatprep.subr.bf16.mxu1 %v2319_v33 }
 0x257   :  { %1953 = vmatpush3.bf16.msra.mxu1 %v2218_v44 }
 0x258   :  { %1954 = vmatprep.subr.bf16.mxu1 %v2319_v33 }
 0x25b   :  { %1955 = vmatpush3.bf16.msra.mxu1 %v2219_v45 }
 0x2fe   :  { %v1299_v37 = vpop.f32.mrf.mxu1 }
 0x2ff   :  { %v1300_v38 = vadd.f32 %v1806_v36, %v1299_v37 }
 0x300   :  { %v1918_v39 = vpop.f32.mrf.mxu1 }
 0x301   :  { %v1305_v40 = vmax.f32 %v1300_v38, 0.0 }
 0x302   :  { %v1302_v41 = vpop.f32.mrf.mxu1 }
 0x303   :  { %v1323_v42 = vpack.c.bf16 %v1305_v40, %v1305_v40 }
 0x304   :  { %v1919_v43 = vpop.f32.mrf.mxu1 }
 0x305   :  { %1937 = vmatmul.mubr.bf16.vlgmr.msra.gmra.mxu0 %v1323_v42 }
 0x306   :  { %1976 = vmatprep.mubr.msk.bf16.mxu0 %vm2320_vm0, %v2319_v33  ;;  %1961 = vmatpush3.bf16.msra.mxu0 %v2220_v46 }
 0x307   :  { %1962 = vmatprep.subr.bf16.mxu0 %v2319_v33 }
 0x30a   :  { %1963 = vmatpush3.bf16.msra.mxu0 %v2221_v47 }
 0x30b   :  { %1964 = vmatprep.subr.bf16.mxu0 %v2319_v33 }
 0x30e   :  { %1965 = vmatpush3.bf16.msra.mxu0 %v2222_v48 }
 0x30f   :  { %1966 = vmatprep.subr.bf16.mxu0 %v2319_v33 }
 0x312   :  { %1967 = vmatpush3.bf16.msra.mxu0 %v2223_v49 }
 0x313   :  { %1968 = vmatprep.subr.bf16.mxu0 %v2319_v33 }
 0x316   :  { %1969 = vmatpush3.bf16.msra.mxu0 %v2224_v50 }
 0x317   :  { %1970 = vmatprep.subr.bf16.mxu0 %v2319_v33 }
 0x31a   :  { %1971 = vmatpush3.bf16.msra.mxu0 %v2225_v51 }
 0x31b   :  { %1972 = vmatprep.subr.bf16.mxu0 %v2319_v33 }
 0x31e   :  { %1973 = vmatpush3.bf16.msra.mxu0 %v2226_v60 }
 0x31f   :  { %1974 = vmatprep.subr.bf16.mxu0 %v2319_v33 }
 0x322   :  { %1975 = vmatpush3.bf16.msra.mxu0 %v2227_v61 }
 0x3c5   :  { %v1412_v53 = vpop.f32.mrf.mxu0 }
 0x3c6   :  { %v1413_v54 = vadd.f32 %v1815_v52, %v1412_v53 }
 0x3c7   :  { %v1938_v55 = vpop.f32.mrf.mxu0 }
 0x3c8   :  { %v1418_v56 = vmax.f32 %v1413_v54, 0.0 }
 0x3c9   :  { %v1415_v57 = vpop.f32.mrf.mxu0 }
 0x3ca   :  { %v1436_v58 = vpack.c.bf16 %v1418_v56, %v1418_v56 }
 0x3cb   :  { %v1939_v59 = vpop.f32.mrf.mxu0 }
 0x3cc   :  { %1957 = vmatmul.mubr.bf16.vlgmr.msra.gmra.mxu1 %v1436_v58 }
 0x48c   :  { %v1525_v63 = vpop.f32.mrf.mxu1 }
 0x48d   :  { %v1526_v0 = vadd.f32 %v1824_v62, %v1525_v63 }
 0x48e   :  { %v1958_v1 = vpop.f32.mrf.mxu1 }
 0x48f   :  { %v1531_v2 = vmax.f32 %v1526_v0, 0.0 }
 0x490   :  { %v1528_v3 = vpop.f32.mrf.mxu1 }
 0x491   :  { %v1549_v4 = vpack.c.bf16 %v1531_v2, %v1531_v2 }
 0x492   :  { %v1959_v5 = vpop.f32.mrf.mxu1 }
 0x493   :  { %1977 = vmatmul.mubr.bf16.vlgmr.msra.gmra.mxu0 %v1549_v4 }
 0x553   :  { %v1638_v7 = vpop.f32.mrf.mxu0 }
 0x554   :  { %v1639_v8 = vadd.f32 %v1833_v6, %v1638_v7 }
 0x555   :  { %v1978_v9 = vpop.f32.mrf.mxu0 }
 0x556   :  { %1644 = vst [vmem:[#allocation8] sm:$0xff] %v1639_v8 }
 0x557   :  { %v1641_v33 = vpop.f32.mrf.mxu0 }
 0x558   :  { %2299 = shalt.err (!%p2296_p5)
}
 0x559   :  { %1654 = dma.vmem_to_hbm [thread:$0]  %s1652_s2, 128, %s2397_s3, [#allocation4]   ;;  %v1979_v10 = vpop.f32.mrf.mxu0 }
 0x55a   :  { %2312 = dma.done.wait [#allocation4], 128  }
 0x55b   :  { %2313 = vsyncadd [#allocation4], 4294967168 }
 0x55c   :  { %1658 = vsyncpa [#allocation3], 1 }
 0x55d   :  { %1659 = vsyncpa [#allocation6], 1 }
 0x55e   :  { %1660 = vsyncpa [#allocation4], 1 }

</bundles_post_ra>
